<compile_context>
chip_gen: v6e
topology: v6e:2x2x1
jax: 0.10.0
libtpu: 0.0.40
codegen_flags: <defaults>
</compile_context>

<pallas_src>
from functools import partial

import jax
import jax.numpy as jnp
from jax import lax
from jax.experimental import pallas as pl
from jax.experimental.pallas import tpu as pltpu


# ---------------- config (synthetic, deterministic) ----------------
VOCAB_SIZE = 64
EMBEDDING_SIZE = 32          # == hidden_size (required for the sum to typecheck)
HIDDEN_SIZE = 32
MAX_POSITION_EMBEDDINGS = 64
TYPE_VOCAB_SIZE = 2
MAX_SEQ_LEN = 64
PAD_TOKEN_ID = 0
LAYER_NORM_EPS = 1e-12

BATCH = 2
SEQ = 8

LANE = 128
SUBLANE = 8


def _ceil_to(x, m):
    return ((x + m - 1) // m) * m


def _embed_ln_kernel(true_e, eps, row_off,
                     wid_ref, tt_ref, sp_ref, pid_ref,   # (N, 1) int32 ids   (VMEM)
                     tab_ref,                            # (4*row_off, EP) combined table
                     gamma_ref, beta_ref,                # (1, EP) LayerNorm params
                     out_ref):                           # (N, EP) output
    n, _ = out_ref.shape
    vt = tab_ref.shape[0]

    # One-hot rows with four disjoint hot columns (word / token-type / span /
    # position): a single MXU matmul gathers and sums all four embedding
    # lookups for every (b, s) row at once.
    col = lax.broadcasted_iota(jnp.int32, (n, vt), 1)
    onehot = ((col == wid_ref[...])
              | (col == tt_ref[...] + row_off)
              | (col == sp_ref[...] + 2 * row_off)
              | (col == pid_ref[...] + 3 * row_off)).astype(jnp.float32)
    x = jnp.dot(onehot, tab_ref[...],
                preferred_element_type=jnp.float32,
                precision=lax.Precision.HIGHEST)          # (N, EP) f32, exact gather

    # Single-pass LayerNorm statistics over the true embedding width; the
    # padded lanes of the table are exactly zero so they do not perturb sums.
    inv_e = jnp.float32(1.0 / true_e)
    s1 = jnp.sum(x, axis=-1, keepdims=True)
    s2 = jnp.sum(x * x, axis=-1, keepdims=True)
    mean = s1 * inv_e
    var = jnp.maximum(s2 * inv_e - mean * mean, 0.0)
    y = (x - mean) * lax.rsqrt(var + jnp.float32(eps))
    y = y * gamma_ref[...] + beta_ref[...]
    # TODO(synk): dropout is identity at inference; training-mode dropout not implemented.
    out_ref[...] = y.astype(out_ref.dtype)


def electra_embeddings(input_ids, token_type_ids, span_ids, position_ids,
                       word_table, tok_table, span_table, pos_table,
                       ln_gamma, ln_beta, *, eps=LAYER_NORM_EPS):
    B, S = input_ids.shape
    E = word_table.shape[1]
    N = B * S

    # Pad the embedding dim to a full 128-lane tile (dense stores / full vreg
    # utilization), and give every table the same padded row count so the row
    # offsets into the combined table are uniform multiples of VR.
    EP = _ceil_to(E, LANE)
    VR = _ceil_to(max(word_table.shape[0], tok_table.shape[0],
                      span_table.shape[0], pos_table.shape[0]), SUBLANE)

    def pad_tab(t):
        return jnp.pad(t, ((0, VR - t.shape[0]), (0, EP - t.shape[1])))

    # Combined (4*VR, EP) table: [word; token_type; span; position].
    table = jnp.concatenate([pad_tab(word_table), pad_tab(tok_table),
                             pad_tab(span_table), pad_tab(pos_table)], axis=0)
    gamma = jnp.pad(ln_gamma, (0, EP - E)).reshape(1, EP)
    beta = jnp.pad(ln_beta, (0, EP - E)).reshape(1, EP)

    # Flattened (B*S, 1) id vectors (positions broadcast over the batch,
    # past_key_values_length = 0).
    wid = input_ids.astype(jnp.int32).reshape(N, 1)
    tt = token_type_ids.astype(jnp.int32).reshape(N, 1)
    sp = span_ids.astype(jnp.int32).reshape(N, 1)
    pid = jnp.broadcast_to(position_ids.astype(jnp.int32)[None, :],
                           (B, S)).reshape(N, 1)

    vmem = pl.BlockSpec(memory_space=pltpu.MemorySpace.VMEM)
    out = pl.pallas_call(
        partial(_embed_ln_kernel, E, eps, VR),
        out_shape=jax.ShapeDtypeStruct((N, EP), jnp.float32),
        in_specs=[vmem] * 7,
        out_specs=vmem,
    )(wid, tt, sp, pid, table, gamma, beta)

    return out.reshape(B, S, EP)[:, :, :E]


def _reference(input_ids, token_type_ids, span_ids, position_ids,
               word_table, tok_table, span_table, pos_table, ln_gamma, ln_beta):
    emb = (word_table[input_ids]
           + tok_table[token_type_ids]
           + span_table[span_ids]
           + pos_table[position_ids][None, :, :])
    mean = jnp.mean(emb, axis=-1, keepdims=True)
    var = jnp.mean((emb - mean) ** 2, axis=-1, keepdims=True)
    return (emb - mean) * lax.rsqrt(var + LAYER_NORM_EPS) * ln_gamma + ln_beta


if __name__ == "__main__":
    key = jax.random.PRNGKey(0)
    k = jax.random.split(key, 8)

    # deterministic parameter init (synthetic weights, no checkpoint)
    word_table = 0.02 * jax.random.normal(k[0], (VOCAB_SIZE, EMBEDDING_SIZE), jnp.float32)
    word_table = word_table.at[PAD_TOKEN_ID].set(0.0)     # padding_idx row zeroed
    tok_table = 0.02 * jax.random.normal(k[1], (TYPE_VOCAB_SIZE, EMBEDDING_SIZE), jnp.float32)
    pos_table = 0.02 * jax.random.normal(k[2], (MAX_POSITION_EMBEDDINGS, EMBEDDING_SIZE), jnp.float32)
    span_table = 0.02 * jax.random.normal(k[3], (MAX_SEQ_LEN, HIDDEN_SIZE), jnp.float32)
    ln_gamma = 1.0 + 0.1 * jax.random.normal(k[6], (EMBEDDING_SIZE,), jnp.float32)
    ln_beta = 0.05 * jax.random.normal(k[7], (EMBEDDING_SIZE,), jnp.float32)

    # inputs
    input_ids = jax.random.randint(k[4], (BATCH, SEQ), 0, VOCAB_SIZE, jnp.int32)
    token_type_ids = jnp.zeros((BATCH, SEQ), jnp.int32)            # buffered default
    span_ids = jax.random.randint(k[5], (BATCH, SEQ), 0, MAX_SEQ_LEN, jnp.int32)
    position_ids = jnp.arange(SEQ, dtype=jnp.int32)                # past_key_values_length = 0

    out = electra_embeddings(input_ids, token_type_ids, span_ids, position_ids,
                             word_table, tok_table, span_table, pos_table,
                             ln_gamma, ln_beta)
    out = jax.block_until_ready(out)

    ref = _reference(input_ids, token_type_ids, span_ids, position_ids,
                     word_table, tok_table, span_table, pos_table, ln_gamma, ln_beta)
    assert out.shape == (BATCH, SEQ, EMBEDDING_SIZE)
    assert jnp.allclose(out, ref, atol=1e-5, rtol=1e-5), "mismatch vs reference"

    print("KERNEL_OK")
</pallas_src>

<mosaic_0001>
module attributes {stable_mosaic.version = 11 : i64} {
  func.func @_embed_ln_kernel(%arg0: memref<16x1xi32, #tpu.memory_space<vmem>>, %arg1: memref<16x1xi32, #tpu.memory_space<vmem>>, %arg2: memref<16x1xi32, #tpu.memory_space<vmem>>, %arg3: memref<16x1xi32, #tpu.memory_space<vmem>>, %arg4: memref<256x128xf32, #tpu.memory_space<vmem>>, %arg5: memref<1x128xf32, #tpu.memory_space<vmem>>, %arg6: memref<1x128xf32, #tpu.memory_space<vmem>>, %arg7: memref<16x128xf32, #tpu.memory_space<vmem>>) attributes {dimension_semantics = [], scalar_prefetch = 0 : i64, scratch_operands = 0 : i64, tpu.core_type = #tpu.core_type<tc>} {
    %0 = tpu.iota {dimensions = array<i32: 1>} : vector<16x256xi32>
    %c0 = arith.constant 0 : index
    %c0_0 = arith.constant 0 : index
    %1 = vector.load %arg0[%c0, %c0_0] : memref<16x1xi32, #tpu.memory_space<vmem>>, vector<16x1xi32>
    %2 = vector.broadcast %1 : vector<16x1xi32> to vector<16x256xi32>
    %3 = arith.cmpi eq, %0, %2 : vector<16x256xi32>
    %c0_1 = arith.constant 0 : index
    %c0_2 = arith.constant 0 : index
    %4 = vector.load %arg1[%c0_1, %c0_2] : memref<16x1xi32, #tpu.memory_space<vmem>>, vector<16x1xi32>
    %c64_i32 = arith.constant 64 : i32
    %5 = vector.broadcast %c64_i32 : i32 to vector<16x1xi32>
    %6 = arith.addi %4, %5 : vector<16x1xi32>
    %7 = vector.broadcast %6 : vector<16x1xi32> to vector<16x256xi32>
    %8 = arith.cmpi eq, %0, %7 : vector<16x256xi32>
    %9 = arith.ori %3, %8 : vector<16x256xi1>
    %c0_3 = arith.constant 0 : index
    %c0_4 = arith.constant 0 : index
    %10 = vector.load %arg2[%c0_3, %c0_4] : memref<16x1xi32, #tpu.memory_space<vmem>>, vector<16x1xi32>
    %c128_i32 = arith.constant 128 : i32
    %11 = vector.broadcast %c128_i32 : i32 to vector<16x1xi32>
    %12 = arith.addi %10, %11 : vector<16x1xi32>
    %13 = vector.broadcast %12 : vector<16x1xi32> to vector<16x256xi32>
    %14 = arith.cmpi eq, %0, %13 : vector<16x256xi32>
    %15 = arith.ori %9, %14 : vector<16x256xi1>
    %c0_5 = arith.constant 0 : index
    %c0_6 = arith.constant 0 : index
    %16 = vector.load %arg3[%c0_5, %c0_6] : memref<16x1xi32, #tpu.memory_space<vmem>>, vector<16x1xi32>
    %c192_i32 = arith.constant 192 : i32
    %17 = vector.broadcast %c192_i32 : i32 to vector<16x1xi32>
    %18 = arith.addi %16, %17 : vector<16x1xi32>
    %19 = vector.broadcast %18 : vector<16x1xi32> to vector<16x256xi32>
    %20 = arith.cmpi eq, %0, %19 : vector<16x256xi32>
    %21 = arith.ori %15, %20 : vector<16x256xi1>
    %22 = arith.extui %21 : vector<16x256xi1> to vector<16x256xi32>
    %23 = arith.sitofp %22 : vector<16x256xi32> to vector<16x256xf32>
    %c0_7 = arith.constant 0 : index
    %c0_8 = arith.constant 0 : index
    %24 = vector.load %arg4[%c0_7, %c0_8] : memref<256x128xf32, #tpu.memory_space<vmem>>, vector<256x128xf32>
    %cst = arith.constant dense<0.000000e+00> : vector<16x128xf32>
    %25 = tpu.matmul %23, %24, %cst {dimension_numbers = #tpu.dot_dimension_numbers<[1], [0], [0], [1], [0, 0, 1, 1], [], []>, precision = #tpu.contract_precision<fp32>} : vector<16x256xf32>, vector<256x128xf32>, vector<16x128xf32> -> vector<16x128xf32>
    %cst_9 = arith.constant dense<0.000000e+00> : vector<16xf32>
    %26 = vector.multi_reduction <add>, %25, %cst_9 [1] : vector<16x128xf32> to vector<16xf32>
    %27 = vector.shape_cast %26 : vector<16xf32> to vector<16x1xf32>
    %28 = arith.mulf %25, %25 : vector<16x128xf32>
    %cst_10 = arith.constant dense<0.000000e+00> : vector<16xf32>
    %29 = vector.multi_reduction <add>, %28, %cst_10 [1] : vector<16x128xf32> to vector<16xf32>
    %30 = vector.shape_cast %29 : vector<16xf32> to vector<16x1xf32>
    %cst_11 = arith.constant 3.125000e-02 : f32
    %31 = vector.broadcast %cst_11 : f32 to vector<16x1xf32>
    %32 = arith.mulf %27, %31 : vector<16x1xf32>
    %cst_12 = arith.constant 3.125000e-02 : f32
    %33 = vector.broadcast %cst_12 : f32 to vector<16x1xf32>
    %34 = arith.mulf %30, %33 : vector<16x1xf32>
    %35 = arith.mulf %32, %32 : vector<16x1xf32>
    %36 = arith.subf %34, %35 : vector<16x1xf32>
    %cst_13 = arith.constant 0.000000e+00 : f32
    %37 = vector.broadcast %cst_13 : f32 to vector<16x1xf32>
    %38 = arith.maximumf %36, %37 : vector<16x1xf32>
    %39 = vector.broadcast %32 : vector<16x1xf32> to vector<16x128xf32>
    %40 = arith.subf %25, %39 : vector<16x128xf32>
    %cst_14 = arith.constant 9.99999996E-13 : f32
    %41 = vector.broadcast %cst_14 : f32 to vector<16x1xf32>
    %42 = arith.addf %38, %41 : vector<16x1xf32>
    %43 = math.rsqrt %42 : vector<16x1xf32>
    %44 = vector.broadcast %43 : vector<16x1xf32> to vector<16x128xf32>
    %45 = arith.mulf %40, %44 : vector<16x128xf32>
    %c0_15 = arith.constant 0 : index
    %c0_16 = arith.constant 0 : index
    %46 = vector.load %arg5[%c0_15, %c0_16] : memref<1x128xf32, #tpu.memory_space<vmem>>, vector<1x128xf32>
    %47 = vector.broadcast %46 : vector<1x128xf32> to vector<16x128xf32>
    %48 = arith.mulf %45, %47 : vector<16x128xf32>
    %c0_17 = arith.constant 0 : index
    %c0_18 = arith.constant 0 : index
    %49 = vector.load %arg6[%c0_17, %c0_18] : memref<1x128xf32, #tpu.memory_space<vmem>>, vector<1x128xf32>
    %50 = vector.broadcast %49 : vector<1x128xf32> to vector<16x128xf32>
    %51 = arith.addf %48, %50 : vector<16x128xf32>
    %c0_19 = arith.constant 0 : index
    %c0_20 = arith.constant 0 : index
    %52 = vector.load %arg7[%c0_19, %c0_20] : memref<16x128xf32, #tpu.memory_space<vmem>>, vector<16x128xf32>
    tpu.vector_store %arg7[%c0_19, %c0_20], %51 {strides = array<i32>} : memref<16x128xf32, #tpu.memory_space<vmem>>, vector<16x128xf32>,
    return
  }
}

</mosaic_0001>

<bundles_post_ra>
// kernel: tpu_custom_call.1
= control target key start
LH: loop header
LB: loop body
LE: loop exit
PB: predicated region body
PF: predicated region fallthrough
CT: control target
= control target key end

     0   :  { %12 = vsyncpa [#allocation3], 0  ;;  %s2094_s0 = inlined_call_operand.vmem [shape: s32[16,1], index: 0, kind: input, shape index: {}]   ;;  %s2095_s1 = inlined_call_operand.vmem [shape: s32[16,1], index: 1, kind: input, shape index: {}]   ;;  %s2096_s2 = inlined_call_operand.vmem [shape: s32[16,1], index: 2, kind: input, shape index: {}]   ;;  %s2097_s3 = inlined_call_operand.vmem [shape: s32[16,1], index: 3, kind: input, shape index: {}]   ;;  %s2098_s4 = inlined_call_operand.hbm [shape: f32[256,128], index: 4, kind: input, shape index: {}]   ;;  %s2099_s5 = inlined_call_operand.vmem [shape: f32[1,128], index: 5, kind: input, shape index: {}]   ;;  %s2100_s6 = inlined_call_operand.vmem [shape: f32[1,128], index: 6, kind: input, shape index: {}]   ;;  %s2101_s7 = inlined_call_operand.hbm [shape: f32[16,128], index: 7, kind: output, shape index: {}]  }
   0x1   :  { %13 = vsyncpa [#allocation4], 0  ;;  %s1436_s24 = smov [#allocation2]  }
   0x2   :  { %s27_s25 = sshll.u32 %s1436_s24, 4  ;;  %s28_s25 = int_to_ptr.vmem [resolvable:$true] %s27_s25 }
   0x3   :  { %s1400_s26 = scalar_lea.vmem %s28_s25, 4096  ;;  %p1405_p1 = scmp.lt.s32.totalorder %s28_s25, %s28_s25 }
   0x4   :  { %p1401_p0 = scmp.ne.s32.totalorder %s28_s25, %s1400_s26  ;;  %p1406_p2 = scmp.lt.s32.totalorder %s1400_s26, %s1400_s26 }
   0x6   :  { %p1407_p3 = por %p1406_p2, %p1405_p1 }
   0x8   :  { %p1408_p4 = pnand %p1407_p3, %p1401_p0 }
   0xa   :  { %1411 = shalt.err (!%p1408_p4)
}
   0xb   :  { %s1437_s27 = smov 128   ;;  %s1438_s28 = smov 8  }
   0xc   :  { %33 = dma.hbm_to_vmem [thread:$0]  %s2098_s4, 4096, %s28_s25, [#allocation3], %s1437_s27, %s1437_s27, %s1438_s28  }
   0xd   :  { %1432 = dma.done.wait [#allocation3], 4096  }
   0xe   :  { %1433 = vsyncadd [#allocation3], 4294963200  ;;  %v1439_v0 = vmov 0   ;;  %v44_v1 = vld [vmem:[%s2094_s0] sm:$0xff]  ;;  %v57_v7 = vld [vmem:[%s2095_s1 + $0x8] sm:$0xff]  ;;  %s1442_s23 = smov [#allocation5]  }
   0xf   :  { %1386 = vset.pattern.permute.xlu0 %v1439_v0  ;;  %1387 = vset.pattern.permute.xlu1 %v1439_v0  ;;  %v74_v2 = vld [vmem:[%s2096_s2] sm:$0xff]  ;;  %v59_v9 = vadd.s32 64, %v57_v7  ;;  %v75_v10 = vld [vmem:[%s2096_s2 + $0x8] sm:$0xff]  ;;  %v149_v12 = vld [vmem:[#allocation2 + $0xf8] sm:$0xff]  ;;  %s1121_s24 = sshll.u32 %s1442_s23, 4  ;;  %s1122_s24 = int_to_ptr.vmem [resolvable:$true] %s1121_s24 }
  0x10   :  { %v56_v3 = vld [vmem:[%s2095_s1] sm:$0xff]  ;;  %47 = vperm.xlu0 %1386, %v44_v1   ;;  %v76_v4 = vadd.s32 128, %v74_v2  ;;  %v93_v11 = vld [vmem:[%s2097_s3 + $0x8] sm:$0xff]  ;;  %v1510_v13 = vadd.s32 128, %v75_v10  ;;  %v1514_v15 = vand.u32 4294901760, %v149_v12  ;;  %v133_v16 = vld [vmem:[#allocation2 + $0x78] sm:$0xff]  ;;  %p1417_p6 = scmp.lt.s32.totalorder %s1122_s24, %s1122_s24 }
  0x11   :  { %v58_v5 = vadd.s32 64, %v56_v3  ;;  %v92_v6 = vld [vmem:[%s2097_s3] sm:$0xff]  ;;  %v1512_v14 = vadd.s32 192, %v93_v11  ;;  %v148_v17 = vld [vmem:[#allocation2 + $0xf0] sm:$0xff]  ;;  %v1516_v19 = vand.u32 4294901760, %v133_v16  ;;  %v147_v22 = vld [vmem:[#allocation2 + $0xe8] sm:$0xff] }
  0x12   :  { %v94_v8 = vadd.s32 192, %v92_v6  ;;  %79 = vperm.xlu1 %1387, %v76_v4   ;;  %v132_v18 = vld [vmem:[#allocation2 + $0x70] sm:$0xff]  ;;  %v1518_v20 = vand.u32 4294901760, %v148_v17  ;;  %v131_v23 = vld [vmem:[#allocation2 + $0x68] sm:$0xff]  ;;  %v146_v24 = vld [vmem:[#allocation2 + $0xe0] sm:$0xff]  ;;  %v1523_v25 = vsub.f32 %v149_v12, %v1514_v15  ;;  %v1525_v26 = vand.u32 4294901760, %v147_v22  ;;  %1151 = vmatprep.subr.mxu0 %v1514_v15 }
  0x13   :  { %v1520_v21 = vand.u32 4294901760, %v132_v18  ;;  %v1527_v27 = vand.u32 4294901760, %v131_v23  ;;  %v1529_v28 = vand.u32 4294901760, %v146_v24  ;;  %v130_v29 = vld [vmem:[#allocation2 + $0x60] sm:$0xff]  ;;  %v45_v30 = vld [vmem:[%s2094_s0 + $0x8] sm:$0xff]  ;;  %v1536_v31 = vsub.f32 %v133_v16, %v1516_v19  ;;  %1152 = vmatpush3.msra.mxu0 %v1516_v19  ;;  %v145_v51 = vld [vmem:[#allocation2 + $0xd8] sm:$0xff] }
  0x14   :  { %61 = vperm.xlu0 %1386, %v58_v5   ;;  %v1539_v32 = vsub.f32 %v148_v17, %v1518_v20  ;;  %v1544_v34 = vand.u32 4294901760, %v130_v29  ;;  %v2121_v35 = vand.u32 4294901760, %v1523_v25  ;;  %v1549_v36 = vsub.f32 %v147_v22, %v1525_v26  ;;  %1153 = vmatprep.subr.mxu0 %v1518_v20  ;;  %v129_v56 = vld [vmem:[#allocation2 + $0x58] sm:$0xff]  ;;  %v144_v57 = vld [vmem:[#allocation2 + $0xd0] sm:$0xff]  ;;  %v143_v63 = vld [vmem:[#allocation2 + $0xc8] sm:$0xff]  ;;  %s1412_s25 = scalar_lea.vmem %s1122_s24, 256 }
  0x15   :  { %v1542_v33 = vsub.f32 %v132_v18, %v1520_v21  ;;  %v1552_v37 = vsub.f32 %v131_v23, %v1527_v27  ;;  %v1555_v38 = vsub.f32 %v146_v24, %v1529_v28  ;;  %v2119_v39 = vand.u32 4294901760, %v1536_v31  ;;  %1154 = vmatpush3.msra.mxu0 %v1520_v21  ;;  %v128_v58 = vld [vmem:[#allocation2 + $0x50] sm:$0xff]  ;;  %v127_v0 = vld [vmem:[#allocation2 + $0x48] sm:$0xff]  ;;  %v142_v1 = vld [vmem:[#allocation2 + $0xc0] sm:$0xff]  ;;  %p1413_p5 = scmp.ne.s32.totalorder %s1122_s24, %s1412_s25  ;;  %p1418_p7 = scmp.lt.s32.totalorder %s1412_s25, %s1412_s25 }
  0x16   :  { %97 = vperm.xlu1 %1387, %v94_v8   ;;  %v2116_v40 = vand.u32 4294901760, %v1539_v32  ;;  %v1562_v42 = vsub.f32 %v130_v29, %v1544_v34  ;;  %v393_v43 = vsub.f32 %v1523_v25, %v2121_v35  ;;  %v2114_v44 = vand.u32 4294901760, %v1549_v36  ;;  %1155 = vmatprep.subr.mxu0 %v1525_v26  ;;  %v126_v6 = vld [vmem:[#allocation2 + $0x40] sm:$0xff]  ;;  %v120_v35 = vld [vmem:[#allocation2 + $0x10] sm:$0xff] }
  0x17   :  { %v2115_v41 = vand.u32 4294901760, %v1542_v33  ;;  %v2112_v45 = vand.u32 4294901760, %v1552_v37  ;;  %v2111_v46 = vand.u32 4294901760, %v1555_v38  ;;  %v281_v47 = vsub.f32 %v1536_v31, %v2119_v39  ;;  %1156 = vmatpush3.msra.mxu0 %v1527_v27  ;;  %v121_v39 = vld [vmem:[#allocation2 + $0x18] sm:$0xff]  ;;  %p1419_p8 = por %p1418_p7, %p1417_p6 }
  0x18   :  { %50 = vperm.xlu0 %1386, %v45_v30   ;;  %v400_v48 = vsub.f32 %v1539_v32, %v2116_v40  ;;  %v2110_v50 = vand.u32 4294901760, %v1562_v42  ;;  %v394_v52 = vand.u32 4294901760, %v393_v43  ;;  %v407_v53 = vsub.f32 %v1549_v36, %v2114_v44  ;;  %1157 = vmatprep.subr.mxu0 %v1529_v28 }
  0x19   :  { %v288_v49 = vsub.f32 %v1542_v33, %v2115_v41  ;;  %v295_v54 = vsub.f32 %v1552_v37, %v2112_v45  ;;  %v414_v55 = vsub.f32 %v1555_v38, %v2111_v46  ;;  %v282_v59 = vand.u32 4294901760, %v281_v47  ;;  %1158 = vmatpush3.msra.mxu0 %v1544_v34  ;;  %v137_v41 = vld [vmem:[#allocation2 + $0x98] sm:$0xff]  ;;  %p1420_p9 = pnand %p1419_p8, %p1413_p5 }
  0x1a   :  { %64 = vperm.xlu1 %1387, %v59_v9   ;;  %v401_v60 = vand.u32 4294901760, %v400_v48  ;;  %v302_v62 = vsub.f32 %v1562_v42, %v2110_v50  ;;  %1189 = vmatprep.subr.mxu1 %v394_v52  ;;  %v408_v2 = vand.u32 4294901760, %v407_v53  ;;  %v1598_v5 = vand.u32 4294901760, %v145_v51 }
  0x1b   :  { %v289_v61 = vand.u32 4294901760, %v288_v49  ;;  %v296_v3 = vand.u32 4294901760, %v295_v54  ;;  %v415_v4 = vand.u32 4294901760, %v414_v55  ;;  %1190 = vmatpush3.msra.mxu1 %v282_v59  ;;  %v1600_v8 = vand.u32 4294901760, %v129_v56  ;;  %v141_v59 = vld [vmem:[#allocation2 + $0xb8] sm:$0xff] }
  0x1c   :  { %82 = vperm.xlu0 %1386, %v1510_v13   ;;  %v303_v7 = vand.u32 4294901760, %v302_v62  ;;  %v1602_v9 = vand.u32 4294901760, %v144_v57  ;;  %v1604_v10 = vand.u32 4294901760, %v128_v58  ;;  %1191 = vmatprep.subr.mxu1 %v401_v60  ;;  %v1608_v11 = vsub.f32 %v145_v51, %v1598_v5 }
  0x1d   :  { %v1610_v12 = vand.u32 4294901760, %v143_v63  ;;  %v1612_v13 = vand.u32 4294901760, %v127_v0  ;;  %v1614_v16 = vand.u32 4294901760, %v142_v1  ;;  %1192 = vmatpush3.msra.mxu1 %v289_v61  ;;  %v1617_v17 = vsub.f32 %v129_v56, %v1600_v8  ;;  %1159 = vmatprep.subr.mxu0 %v1598_v5 }
  0x1e   :  { %100 = vperm.xlu1 %1387, %v1512_v14   ;;  %v1620_v18 = vsub.f32 %v144_v57, %v1602_v9  ;;  %v1623_v22 = vsub.f32 %v128_v58, %v1604_v10  ;;  %v1625_v14 = vand.u32 4294901760, %v126_v6  ;;  %1193 = vmatprep.subr.mxu1 %v408_v2  ;;  %v2108_v23 = vand.u32 4294901760, %v1608_v11  ;;  %v124_v2 = vld [vmem:[#allocation2 + $0x30] sm:$0xff] }
  0x1f   :  { %v1630_v24 = vsub.f32 %v143_v63, %v1610_v12  ;;  %v1633_v29 = vsub.f32 %v127_v0, %v1612_v13  ;;  %v1636_v30 = vsub.f32 %v142_v1, %v1614_v16  ;;  %1160 = vmatpush3.msra.mxu0 %v1600_v8  ;;  %1194 = vmatpush3.msra.mxu1 %v296_v3  ;;  %v2107_v43 = vand.u32 4294901760, %v1617_v17  ;;  %v125_v0 = vld [vmem:[#allocation2 + $0x38] sm:$0xff]  ;;  %v140_v1 = vld [vmem:[#allocation2 + $0xb0] sm:$0xff] }
  0x20   :  { %v2106_v47 = vand.u32 4294901760, %v1620_v18  ;;  %v2103_v48 = vand.u32 4294901760, %v1623_v22  ;;  %v1643_v49 = vsub.f32 %v126_v6, %v1625_v14  ;;  %1161 = vmatprep.subr.mxu0 %v1602_v9  ;;  %1195 = vmatprep.subr.mxu1 %v415_v4  ;;  %v421_v51 = vsub.f32 %v1608_v11, %v2108_v23  ;;  %v122_v23 = vld [vmem:[#allocation2 + $0x20] sm:$0xff] }
  0x21   :  { %v2102_v52 = vand.u32 4294901760, %v1630_v24  ;;  %v2104_v53 = vand.u32 4294901760, %v1633_v29  ;;  %v2105_v54 = vand.u32 4294901760, %v1636_v30  ;;  %1162 = vmatpush3.msra.mxu0 %v1604_v10  ;;  %1196 = vmatpush3.msra.mxu1 %v303_v7  ;;  %v309_v55 = vsub.f32 %v1617_v17, %v2107_v43 }
  0x22   :  { %2175 = vst [vmem:[#allocation8_spill] sm:$0xff] %v1643_v49  ;;  %v428_v56 = vsub.f32 %v1620_v18, %v2106_v47  ;;  %v316_v57 = vsub.f32 %v1623_v22, %v2103_v48  ;;  %v2109_v58 = vand.u32 4294901760, %v1643_v49  ;;  %1163 = vmatprep.subr.mxu0 %v1610_v12  ;;  %v422_v60 = vand.u32 4294901760, %v421_v51  ;;  %v139_v51 = vld [vmem:[#allocation2 + $0xa8] sm:$0xff]  ;;  %v138_v48 = vld [vmem:[#allocation2 + $0xa0] sm:$0xff] }
  0x23   :  { %v435_v61 = vsub.f32 %v1630_v24, %v2102_v52  ;;  %v323_v62 = vsub.f32 %v1633_v29, %v2104_v53  ;;  %v442_v63 = vsub.f32 %v1636_v30, %v2105_v54  ;;  %1164 = vmatpush3.msra.mxu0 %v1612_v13  ;;  %v310_v3 = vand.u32 4294901760, %v309_v55  ;;  %v123_v52 = vld [vmem:[#allocation2 + $0x28] sm:$0xff] }
  0x24   :  { %v429_v4 = vand.u32 4294901760, %v428_v56  ;;  %v317_v6 = vand.u32 4294901760, %v316_v57  ;;  %v330_v7 = vsub.f32 %v1643_v49, %v2109_v58  ;;  %1165 = vmatprep.subr.mxu0 %v1614_v16  ;;  %1197 = vmatprep.subr.mxu1 %v422_v60  ;;  %v1678_v43 = vand.u32 4294901760, %v141_v59 }
  0x25   :  { %v436_v53 = vand.u32 4294901760, %v435_v61  ;;  %v324_v54 = vand.u32 4294901760, %v323_v62  ;;  %v443_v47 = vand.u32 4294901760, %v442_v63  ;;  %1166 = vmatpush3.msra.mxu0 %v1625_v14  ;;  %1198 = vmatpush3.msra.mxu1 %v310_v3  ;;  %v1681_v56 = vand.u32 4294901760, %v125_v0 }
  0x26   :  { %v331_v55 = vand.u32 4294901760, %v330_v7  ;;  %v1683_v57 = vand.u32 4294901760, %v140_v1  ;;  %v1685_v58 = vand.u32 4294901760, %v124_v2  ;;  %1199 = vmatprep.subr.mxu1 %v429_v4  ;;  %v1688_v50 = vsub.f32 %v141_v59, %v1678_v43  ;;  %1167 = vmatprep.subr.mxu0 %v1678_v43 }
  0x27   :  { %v1690_v60 = vand.u32 4294901760, %v139_v51  ;;  %v1692_v61 = vand.u32 4294901760, %v123_v52  ;;  %v1694_v62 = vand.u32 4294901760, %v138_v48  ;;  %1200 = vmatpush3.msra.mxu1 %v317_v6  ;;  %v1698_v63 = vsub.f32 %v125_v0, %v1681_v56  ;;  %1168 = vmatpush3.msra.mxu0 %v1681_v56 }
  0x28   :  { %2176 = vst [vmem:[#allocation9_spill] sm:$0xff] %v1688_v50  ;;  %v1701_v3 = vsub.f32 %v140_v1, %v1683_v57  ;;  %v1704_v4 = vsub.f32 %v124_v2, %v1685_v58  ;;  %v1706_v59 = vand.u32 4294901760, %v122_v23  ;;  %1201 = vmatprep.subr.mxu1 %v436_v53  ;;  %v2113_v7 = vand.u32 4294901760, %v1688_v50  ;;  %1169 = vmatprep.subr.mxu0 %v1683_v57 }
  0x29   :  { %2177 = vst [vmem:[#allocation10_spill] sm:$0xff] %v1698_v63  ;;  %v1711_v46 = vsub.f32 %v139_v51, %v1690_v60  ;;  %v1714_v6 = vsub.f32 %v123_v52, %v1692_v61  ;;  %v1717_v0 = vsub.f32 %v138_v48, %v1694_v62  ;;  %1202 = vmatpush3.msra.mxu1 %v324_v54  ;;  %v2117_v1 = vand.u32 4294901760, %v1698_v63 }
  0x2a   :  { %2178 = vst [vmem:[#allocation11_spill] sm:$0xff] %v1701_v3  ;;  %2179 = vst [vmem:[#allocation12_spill] sm:$0xff] %v1704_v4  ;;  %v2118_v2 = vand.u32 4294901760, %v1701_v3  ;;  %v2120_v53 = vand.u32 4294901760, %v1704_v4  ;;  %v1724_v45 = vsub.f32 %v122_v23, %v1706_v59  ;;  %1170 = vmatpush3.msra.mxu0 %v1685_v58  ;;  %1203 = vmatprep.subr.mxu1 %v443_v47  ;;  %v1761_v49 = vand.u32 4294901760, %v121_v39 }
  0x2b   :  { %2180 = vst [vmem:[#allocation13_spill] sm:$0xff] %v1711_v46  ;;  %2181 = vst [vmem:[#allocation14_spill] sm:$0xff] %v1714_v6  ;;  %v449_v48 = vsub.f32 %v1688_v50, %v2113_v7  ;;  %v2126_v52 = vand.u32 4294901760, %v1711_v46  ;;  %v2131_v54 = vand.u32 4294901760, %v1714_v6  ;;  %v2134_v51 = vand.u32 4294901760, %v1717_v0  ;;  %1171 = vmatprep.subr.mxu0 %v1690_v60  ;;  %1204 = vmatpush3.msra.mxu1 %v331_v55 }
  0x2c   :  { %2182 = vst [vmem:[#allocation15_spill] sm:$0xff] %v1717_v0  ;;  %2183 = vst [vmem:[#allocation16_spill] sm:$0xff] %v1724_v45  ;;  %v337_v23 = vsub.f32 %v1698_v63, %v2117_v1  ;;  %v456_v47 = vsub.f32 %v1701_v3, %v2118_v2  ;;  %v344_v7 = vsub.f32 %v1704_v4, %v2120_v53  ;;  %1172 = vmatpush3.msra.mxu0 %v1692_v61  ;;  %v136_v53 = vld [vmem:[#allocation2 + $0x90] sm:$0xff]  ;;  %v119_v63 = vld [vmem:[#allocation2 + $0x8] sm:$0xff] }
  0x2d   :  { %v450_v40 = vand.u32 4294901760, %v449_v48  ;;  %v463_v55 = vsub.f32 %v1711_v46, %v2126_v52  ;;  %v351_v1 = vsub.f32 %v1714_v6, %v2131_v54  ;;  %v470_v2 = vsub.f32 %v1717_v0, %v2134_v51  ;;  %1173 = vmatprep.subr.mxu0 %v1694_v62  ;;  %v135_v46 = vld [vmem:[#allocation2 + $0x88] sm:$0xff]  ;;  %v134_v0 = vld [vmem:[#allocation2 + $0x80] sm:$0xff]  ;;  %2185 = vst [vmem:[#allocation17_spill] sm:$0xff] %v1761_v49 }
  0x2e   :  { %v338_v44 = vand.u32 4294901760, %v337_v23  ;;  %v457_v4 = vand.u32 4294901760, %v456_v47  ;;  %v345_v48 = vand.u32 4294901760, %v344_v7  ;;  %v2184_v3 = vand.u32 4294901760, %v1724_v45  ;;  %1174 = vmatpush3.msra.mxu0 %v1706_v59  ;;  %v118_v47 = vld [vmem:[#allocation2] sm:$0xff] }
  0x2f   :  { %1205 = vmatprep.subr.mxu1 %v450_v40  ;;  %v464_v54 = vand.u32 4294901760, %v463_v55  ;;  %v352_v6 = vand.u32 4294901760, %v351_v1  ;;  %v1759_v51 = vand.u32 4294901760, %v137_v41  ;;  %v471_v50 = vand.u32 4294901760, %v470_v2 }
  0x30   :  { %v358_v52 = vsub.f32 %v1724_v45, %v2184_v3  ;;  %1206 = vmatpush3.msra.mxu1 %v338_v44  ;;  %v1763_v23 = vand.u32 4294901760, %v136_v53  ;;  %v1765_v7 = vand.u32 4294901760, %v120_v35  ;;  %v1770_v40 = vand.u32 4294901760, %v135_v46 }
  0x31   :  { %1207 = vmatprep.subr.mxu1 %v457_v4  ;;  %v1768_v45 = vsub.f32 %v137_v41, %v1759_v51  ;;  %v1772_v1 = vand.u32 4294901760, %v119_v63  ;;  %1175 = vmatprep.subr.mxu0 %v1759_v51  ;;  %v1776_v44 = vsub.f32 %v121_v39, %v1761_v49  ;;  %v1784_v4 = vand.u32 4294901760, %v134_v0 }
  0x32   :  { %2186 = vst [vmem:[#allocation18_spill] sm:$0xff] %v1765_v7  ;;  %v359_v3 = vand.u32 4294901760, %v358_v52  ;;  %2188 = vst [vmem:[#allocation20_spill] sm:$0xff] %v1770_v40  ;;  %1208 = vmatpush3.msra.mxu1 %v345_v48  ;;  %v1779_v2 = vsub.f32 %v136_v53, %v1763_v23  ;;  %v1782_v55 = vsub.f32 %v120_v35, %v1765_v7  ;;  %1176 = vmatpush3.msra.mxu0 %v1761_v49 }
  0x33   :  { %2187 = vst [vmem:[#allocation19_spill] sm:$0xff] %v1768_v45  ;;  %2189 = vst [vmem:[#allocation21_spill] sm:$0xff] %v1772_v1  ;;  %1209 = vmatprep.subr.mxu1 %v464_v54  ;;  %v2145_v41 = vand.u32 4294901760, %v1768_v45  ;;  %v1789_v52 = vsub.f32 %v135_v46, %v1770_v40  ;;  %v1792_v48 = vsub.f32 %v119_v63, %v1772_v1  ;;  %v1794_v39 = vand.u32 4294901760, %v118_v47 }
  0x34   :  { %2190 = vst [vmem:[#allocation22_spill] sm:$0xff] %v1776_v44  ;;  %2191 = vst [vmem:[#allocation23_spill] sm:$0xff] %v1779_v2  ;;  %1177 = vmatprep.subr.mxu0 %v1763_v23  ;;  %1210 = vmatpush3.msra.mxu1 %v352_v6  ;;  %v2152_v53 = vand.u32 4294901760, %v1779_v2  ;;  %v1801_v54 = vsub.f32 %v134_v0, %v1784_v4  ;;  %v2196_v0 = vand.u32 4294901760, %v1776_v44 }
  0x35   :  { %2192 = vst [vmem:[#allocation24_spill] sm:$0xff] %v1782_v55  ;;  %2193 = vst [vmem:[#allocation25_spill] sm:$0xff] %v1784_v4  ;;  %1178 = vmatpush3.msra.mxu0 %v1765_v7  ;;  %1211 = vmatprep.subr.mxu1 %v471_v50  ;;  %v477_v46 = vsub.f32 %v1768_v45, %v2145_v41  ;;  %v1810_v35 = vsub.f32 %v118_v47, %v1794_v39  ;;  %v2197_v41 = vand.u32 4294901760, %v1782_v55 }
  0x36   :  { %2194 = vst [vmem:[#allocation26_spill] sm:$0xff] %v1794_v39  ;;  %2195 = vst [vmem:[#allocation27_spill] sm:$0xff] %v1801_v54  ;;  %1179 = vmatprep.subr.mxu0 %v1770_v40  ;;  %1212 = vmatpush3.msra.mxu1 %v359_v3  ;;  %v365_v49 = vsub.f32 %v1776_v44, %v2196_v0  ;;  %v484_v50 = vsub.f32 %v1779_v2, %v2152_v53  ;;  %v2157_v6 = vand.u32 4294901760, %v1801_v54 }
  0x37   :  { %v372_v63 = vsub.f32 %v1782_v55, %v2197_v41  ;;  %1180 = vmatpush3.msra.mxu0 %v1772_v1  ;;  %v478_v47 = vand.u32 4294901760, %v477_v46  ;;  %v2198_v45 = vand.u32 4294901760, %v1789_v52  ;;  %v2199_v40 = vand.u32 4294901760, %v1792_v48 }
  0x38   :  { %v2160_v44 = vand.u32 4294901760, %v1810_v35  ;;  %1181 = vmatprep.subr.mxu0 %v1784_v4  ;;  %v366_v53 = vand.u32 4294901760, %v365_v49  ;;  %v485_v2 = vand.u32 4294901760, %v484_v50  ;;  %v498_v55 = vsub.f32 %v1801_v54, %v2157_v6 }
  0x39   :  { %v491_v3 = vsub.f32 %v1789_v52, %v2198_v45  ;;  %v379_v0 = vsub.f32 %v1792_v48, %v2199_v40  ;;  %v373_v41 = vand.u32 4294901760, %v372_v63  ;;  %1182 = vmatpush3.msra.mxu0 %v1794_v39  ;;  %1213 = vmatprep.subr.mxu1 %v478_v47  ;;  %v41_v50 = vlaneseq }
  0x3a   :  { %v386_v45 = vsub.f32 %v1810_v35, %v2160_v44  ;;  %1227 = vmatprep.subr.mxu0 %v1523_v25  ;;  %1214 = vmatpush3.msra.mxu1 %v366_v53  ;;  %v499_v49 = vand.u32 4294901760, %v498_v55  ;;  %v2200_v53 = vmov 0 }
  0x3b   :  { %v492_v46 = vand.u32 4294901760, %v491_v3  ;;  %v380_v40 = vand.u32 4294901760, %v379_v0  ;;  %1215 = vmatprep.subr.mxu1 %v485_v2  ;;  %v42_v47 = vand.u32 127, %v41_v50 }
  0x3c   :  { %1216 = vmatpush3.msra.mxu1 %v373_v41  ;;  %v387_v63 = vand.u32 4294901760, %v386_v45  ;;  %v2164_v45 = vmov 1.0  }
  0x3d   :  { %1217 = vmatprep.subr.mxu1 %v492_v46  ;;  %v43_v6 = vadd.s32 128, %v42_v47 }
  0x3e   :  { %1218 = vmatpush3.msra.mxu1 %v380_v40 }
  0x3f   :  { %1219 = vmatprep.subr.mxu1 %v499_v49 }
  0x40   :  { %1220 = vmatpush3.msra.mxu1 %v387_v63 }
  0x41   :  { %1265 = vmatprep.subr.mxu1 %v1514_v15 }
  0x8b   :  { %v48_v3 = vpop.permute.xlu0 %47 }
  0x8c   :  { %vm52_vm0 = vcmp.eq.s32.totalorder %v42_v47, %v48_v3  ;;  %vm53_vm3 = vcmp.eq.s32.totalorder %v43_v6, %v48_v3 }
  0x8d   :  { %v80_v54 = vpop.permute.xlu1 %79 }
  0x8e   :  { %vm84_vm5 = vcmp.eq.s32.totalorder %v42_v47, %v80_v54  ;;  %vm85_vm8 = vcmp.eq.s32.totalorder %v43_v6, %v80_v54 }
  0x8f   :  { %v62_v44 = vpop.permute.xlu0 %61 }
  0x90   :  { %vm66_vm1 = vcmp.eq.s32.totalorder %v42_v47, %v62_v44  ;;  %vm67_vm2 = vcmp.eq.s32.totalorder %v43_v6, %v62_v44  ;;  %v1440_v44 = vmov 0.0  }
  0x91   :  { %vm70_vm4 = vmor %vm52_vm0, %vm66_vm1  ;;  %v98_v2 = vpop.permute.xlu1 %97 }
  0x92   :  { %vm71_vm6 = vmor %vm53_vm3, %vm67_vm2  ;;  %vm102_vm7 = vcmp.eq.s32.totalorder %v42_v47, %v98_v2  ;;  %vm103_vm10 = vcmp.eq.s32.totalorder %v43_v6, %v98_v2 }
  0x93   :  { %vm88_vm9 = vmor %vm70_vm4, %vm84_vm5  ;;  %v51_v55 = vpop.permute.xlu0 %50 }
  0x94   :  { %vm89_vm11 = vmor %vm71_vm6, %vm85_vm8  ;;  %vm54_vm14 = vcmp.eq.s32.totalorder %v42_v47, %v51_v55  ;;  %vm55_vm1 = vcmp.eq.s32.totalorder %v43_v6, %v51_v55  ;;  %v2205_v55 = vmov 0 }
  0x95   :  { %vm1841_vm12 = vmor %vm88_vm9, %vm102_vm7  ;;  %v65_v0 = vpop.permute.xlu1 %64 }
  0x96   :  { %v2201_v53 = vsel %vm1841_vm12, 4294967295, %v2200_v53  ;;  %vm1845_vm13 = vmor %vm89_vm11, %vm103_vm10  ;;  %v1133_v46 = vsel %vm1841_vm12, 1.0, %v1440_v44  ;;  %vm68_vm15 = vcmp.eq.s32.totalorder %v42_v47, %v65_v0  ;;  %vm69_vm0 = vcmp.eq.s32.totalorder %v43_v6, %v65_v0 }
  0x97   :  { %2202 = vst [vmem:[#allocation28_spill] sm:$0xff] %v2201_v53  ;;  %v1851_v54 = vsub.f32 %v1133_v46, %v1133_v46  ;;  %1137 = vmatprep.mubr.msk.f32.mxu1 %vm1845_vm13, %v2164_v45  ;;  %vm72_vm2 = vmor %vm54_vm14, %vm68_vm15  ;;  %v83_v40 = vpop.permute.xlu0 %82  ;;  %v1134_v49 = vsel %vm1845_vm13, 1.0, %v1440_v44  ;;  %v2208_v46 = vmov 0 }
  0x98   :  { %vm73_vm3 = vmor %vm55_vm1, %vm69_vm0  ;;  %1138 = vmatmul.mubr.msk.f32.vlgmr.msra.gmra.mxu1 %vm1841_vm12, %v2164_v45  ;;  %vm86_vm4 = vcmp.eq.s32.totalorder %v42_v47, %v83_v40  ;;  %vm87_vm5 = vcmp.eq.s32.totalorder %v43_v6, %v83_v40  ;;  %v247_v63 = vsub.f32 %v1134_v49, %v1134_v49 }
  0x99   :  { %1266 = vmatpush3.msra.mxu1 %v1516_v19  ;;  %vm90_vm6 = vmor %vm72_vm2, %vm86_vm4  ;;  %v101_v50 = vpop.permute.xlu1 %100  ;;  %v2161_v3 = vand.u32 4294901760, %v1851_v54 }
  0x9a   :  { %1267 = vmatprep.subr.mxu1 %v1518_v20  ;;  %vm91_vm7 = vmor %vm73_vm3, %vm87_vm5  ;;  %vm104_vm8 = vcmp.eq.s32.totalorder %v42_v47, %v101_v50  ;;  %vm105_vm9 = vcmp.eq.s32.totalorder %v43_v6, %v101_v50  ;;  %v248_v2 = vand.u32 4294901760, %v247_v63 }
  0x9b   :  { %1268 = vmatpush3.msra.mxu1 %v1520_v21  ;;  %vm1865_vm10 = vmor %vm90_vm6, %vm104_vm8  ;;  %v255_v0 = vsub.f32 %v1851_v54, %v2161_v3 }
  0x9c   :  { %v2206_v55 = vsel %vm1865_vm10, 4294967295, %v2205_v55  ;;  %1269 = vmatprep.subr.mxu1 %v1525_v26  ;;  %vm1873_vm11 = vmor %vm91_vm7, %vm105_vm9  ;;  %v1135_v6 = vsel %vm1865_vm10, 1.0, %v1440_v44  ;;  %v249_v47 = vsub.f32 %v247_v63, %v248_v2 }
  0x9d   :  { %2207 = vst [vmem:[#allocation29_spill] sm:$0xff] %v2206_v55  ;;  %v2209_v46 = vsel %vm1873_vm11, 4294967295, %v2208_v46  ;;  %v1136_v40 = vsel %vm1873_vm11, 1.0, %v1440_v44  ;;  %v1881_v49 = vsub.f32 %v1135_v6, %v1135_v6  ;;  %1270 = vmatpush3.msra.mxu1 %v1527_v27  ;;  %1139 = vmatprep.mubr.msk.f32.mxu1 %vm1873_vm11, %v2164_v45  ;;  %v256_v50 = vand.u32 4294901760, %v255_v0  ;;  %v2220_v55 = vld [vmem:[#allocation15_spill] sm:$0xff] }
  0x9e   :  { %2210 = vst [vmem:[#allocation30_spill] sm:$0xff] %v2209_v46  ;;  %v1887_v3 = vsub.f32 %v1136_v40, %v1136_v40  ;;  %1271 = vmatprep.subr.mxu1 %v1529_v28  ;;  %v250_v53 = vand.u32 4294901760, %v249_v47  ;;  %1140 = vmatmul.mubr.msk.f32.gmra.mxu1 %vm1865_vm10, %v2164_v45  ;;  %v2211_v40 = vld [vmem:[#allocation8_spill] sm:$0xff]  ;;  %v2218_v45 = vld [vmem:[#allocation13_spill] sm:$0xff] }
  0x9f   :  { %1272 = vmatpush3.msra.mxu1 %v1544_v34  ;;  %762 = vmatprep.mubr.f32.mxu1 %v248_v2  ;;  %v2166_v44 = vand.u32 4294901760, %v1881_v49  ;;  %v2221_v46 = vld [vmem:[#allocation16_spill] sm:$0xff] }
  0xa0   :  { %1273 = vmatprep.subr.mxu1 %v1598_v5  ;;  %251 = vmatprep.mubr.f32.mxu0 %v250_v53  ;;  %v263_v6 = vand.u32 4294901760, %v1887_v3 }
  0xa1   :  { %1274 = vmatpush3.msra.mxu1 %v1600_v8  ;;  %257 = vmatmul.mubr.f32.vlgmr.msra.gmra.mxu0 %v256_v50  ;;  %v270_v2 = vsub.f32 %v1881_v49, %v2166_v44  ;;  %v2213_v50 = vld [vmem:[#allocation17_spill] sm:$0xff]  ;;  %v2219_v44 = vld [vmem:[#allocation14_spill] sm:$0xff] }
  0xa2   :  { %1228 = vmatpush3.msra.mxu0 %v1536_v31  ;;  %1275 = vmatprep.subr.mxu1 %v1602_v9  ;;  %v264_v0 = vsub.f32 %v1887_v3, %v263_v6 }
  0xa3   :  { %1229 = vmatprep.subr.mxu0 %v1539_v32  ;;  %1276 = vmatpush3.msra.mxu1 %v1604_v10  ;;  %v271_v47 = vand.u32 4294901760, %v270_v2  ;;  %v2215_v2 = vld [vmem:[#allocation11_spill] sm:$0xff] }
  0xa4   :  { %1230 = vmatpush3.msra.mxu0 %v1542_v33  ;;  %1277 = vmatprep.subr.mxu1 %v1610_v12  ;;  %v265_v53 = vand.u32 4294901760, %v264_v0  ;;  %v2214_v0 = vld [vmem:[#allocation10_spill] sm:$0xff] }
  0xa5   :  { %1231 = vmatprep.subr.mxu0 %v1549_v36  ;;  %1278 = vmatpush3.msra.mxu1 %v1612_v13 }
  0xa6   :  { %1232 = vmatpush3.msra.mxu0 %v1552_v37  ;;  %1279 = vmatprep.subr.mxu1 %v1614_v16 }
  0xa7   :  { %1233 = vmatprep.subr.mxu0 %v1555_v38  ;;  %1280 = vmatpush3.msra.mxu1 %v1625_v14 }
  0xa8   :  { %1234 = vmatpush3.msra.mxu0 %v1562_v42  ;;  %1281 = vmatprep.subr.mxu1 %v1678_v43 }
  0xa9   :  { %266 = vmatprep.mubr.f32.mxu0 %v265_v53  ;;  %1235 = vmatprep.subr.mxu0 %v1608_v11  ;;  %v2216_v53 = vld [vmem:[#allocation12_spill] sm:$0xff] }
  0xaa   :  { %1282 = vmatpush3.msra.mxu1 %v1681_v56  ;;  %272 = vmatmul.mubr.f32.gmra.mxu0 %v271_v47  ;;  %v2217_v47 = vld [vmem:[#allocation20_spill] sm:$0xff] }
  0xab   :  { %1236 = vmatpush3.msra.mxu0 %v1617_v17  ;;  %1283 = vmatprep.subr.mxu1 %v1683_v57 }
  0xac   :  { %1237 = vmatprep.subr.mxu0 %v1620_v18  ;;  %646 = vmatprep.mubr.f32.mxu0 %v247_v63  ;;  %v2212_v63 = vld [vmem:[#allocation9_spill] sm:$0xff] }
  0xad   :  { %1284 = vmatpush3.msra.mxu1 %v1685_v58  ;;  %1238 = vmatpush3.msra.mxu0 %v1623_v22 }
  0xae   :  { %1285 = vmatprep.subr.mxu1 %v1690_v60  ;;  %1239 = vmatprep.subr.mxu0 %v1630_v24 }
  0xaf   :  { %1286 = vmatpush3.msra.mxu1 %v1692_v61  ;;  %1240 = vmatpush3.msra.mxu0 %v1633_v29 }
  0xb0   :  { %1287 = vmatprep.subr.mxu1 %v1694_v62  ;;  %1241 = vmatprep.subr.mxu0 %v1636_v30 }
  0xb1   :  { %1288 = vmatpush3.msra.mxu1 %v1706_v59  ;;  %1242 = vmatpush3.msra.mxu0 %v2211_v40 }
  0xb2   :  { %1289 = vmatprep.subr.mxu1 %v1759_v51  ;;  %1243 = vmatprep.subr.mxu0 %v2212_v63 }
  0xb3   :  { %1290 = vmatpush3.msra.mxu1 %v2213_v50  ;;  %1244 = vmatpush3.msra.mxu0 %v2214_v0 }
  0xb4   :  { %1291 = vmatprep.subr.mxu1 %v1763_v23  ;;  %1245 = vmatprep.subr.mxu0 %v2215_v2 }
  0xb5   :  { %1292 = vmatpush3.msra.mxu1 %v1765_v7  ;;  %1246 = vmatpush3.msra.mxu0 %v2216_v53  ;;  %v2222_v7 = vand.u32 4294901760, %v1851_v54 }
  0xb6   :  { %1293 = vmatprep.subr.mxu1 %v2217_v47  ;;  %1247 = vmatprep.subr.mxu0 %v2218_v45  ;;  %v2223_v47 = vld [vmem:[#allocation19_spill] sm:$0xff] }
  0xb7   :  { %1294 = vmatpush3.msra.mxu1 %v1772_v1  ;;  %1248 = vmatpush3.msra.mxu0 %v2219_v44  ;;  %v2224_v1 = vld [vmem:[#allocation22_spill] sm:$0xff] }
  0xb8   :  { %1295 = vmatprep.subr.mxu1 %v1784_v4  ;;  %1249 = vmatprep.subr.mxu0 %v2220_v55  ;;  %v2225_v4 = vld [vmem:[#allocation23_spill] sm:$0xff] }
  0xb9   :  { %1296 = vmatpush3.msra.mxu1 %v1794_v39  ;;  %1250 = vmatpush3.msra.mxu0 %v2221_v46  ;;  %v2226_v39 = vld [vmem:[#allocation24_spill] sm:$0xff]  ;;  %v2227_v46 = vand.u32 4294901760, %v1881_v49 }
  0xba   :  { %766 = vmatmul.mubr.f32.vlgmr.msra.gmra.mxu1 %v2222_v7  ;;  %1341 = vmatprep.subr.mxu1 %v1514_v15  ;;  %v2228_v15 = vmov 1.0  }
  0xbb   :  { %1251 = vmatprep.subr.mxu0 %v2223_v47  ;;  %773 = vmatprep.mubr.f32.mxu1 %v263_v6 }
  0xbc   :  { %1342 = vmatpush3.msra.mxu1 %v1516_v19  ;;  %1252 = vmatpush3.msra.mxu0 %v2224_v1  ;;  %v2229_v19 = vld [vmem:[#allocation27_spill] sm:$0xff] }
  0xbd   :  { %1343 = vmatprep.subr.mxu1 %v1518_v20  ;;  %1253 = vmatprep.subr.mxu0 %v2225_v4  ;;  %v2230_v20 = vand.u32 4294901760, %v1523_v25  ;;  %v2234_v25 = vand.u32 4294901760, %v1549_v36  ;;  %v2240_v36 = vand.u32 4294901760, %v1620_v18  ;;  %v2253_v18 = vld [vmem:[#allocation21_spill] sm:$0xff]  ;;  %v2269_v7 = vand.u32 4294901760, %v2229_v19 }
  0xbe   :  { %1344 = vmatpush3.msra.mxu1 %v1520_v21  ;;  %1254 = vmatpush3.msra.mxu0 %v2226_v39  ;;  %v2231_v21 = vand.u32 4294901760, %v1536_v31  ;;  %v2236_v31 = vand.u32 4294901760, %v1555_v38  ;;  %v2242_v38 = vand.u32 4294901760, %v1630_v24  ;;  %v2256_v24 = vand.u32 4294901760, %v2220_v55 }
  0xbf   :  { %777 = vmatmul.mubr.f32.gmra.mxu1 %v2227_v46  ;;  %1345 = vmatprep.subr.mxu1 %v1525_v26  ;;  %v2232_v26 = vand.u32 4294901760, %v1539_v32  ;;  %v2237_v32 = vand.u32 4294901760, %v1562_v42  ;;  %v2243_v42 = vand.u32 4294901760, %v1633_v29  ;;  %v2257_v29 = vld [vmem:[#allocation26_spill] sm:$0xff] }
  0xc0   :  { %1255 = vmatprep.subr.mxu0 %v1789_v52  ;;  %1346 = vmatpush3.msra.mxu1 %v1527_v27  ;;  %v2233_v27 = vand.u32 4294901760, %v1542_v33  ;;  %v2238_v33 = vand.u32 4294901760, %v1608_v11  ;;  %v2248_v11 = vand.u32 4294901760, %v2215_v2 }
  0xc1   :  { %1145 = vmatprep.mubr.msk.f32.mxu1 %vm1845_vm13, %v2228_v15  ;;  %1256 = vmatpush3.msra.mxu0 %v1792_v48 }
  0xc2   :  { %1347 = vmatprep.subr.mxu1 %v1529_v28  ;;  %1257 = vmatprep.subr.mxu0 %v2229_v19  ;;  %v2235_v28 = vand.u32 4294901760, %v1552_v37  ;;  %v2241_v37 = vand.u32 4294901760, %v1623_v22  ;;  %v2254_v22 = vand.u32 4294901760, %v2219_v44 }
  0xc3   :  { %1348 = vmatpush3.msra.mxu1 %v1544_v34  ;;  %1258 = vmatpush3.msra.mxu0 %v1810_v35  ;;  %v2239_v34 = vand.u32 4294901760, %v1617_v17  ;;  %v2252_v17 = vand.u32 4294901760, %v2218_v45 }
  0xc4   :  { %1349 = vmatprep.subr.mxu1 %v1598_v5  ;;  %649 = vmatmul.mubr.f32.vlgmr.msra.gmra.mxu0 %v1851_v54  ;;  %v2244_v5 = vand.u32 4294901760, %v1636_v30  ;;  %v2258_v30 = vld [vmem:[#allocation16_spill] sm:$0xff] }
  0xc5   :  { %1303 = vmatprep.subr.mxu0 %v2230_v20  ;;  %1350 = vmatpush3.msra.mxu1 %v1600_v8  ;;  %v2245_v8 = vand.u32 4294901760, %v2211_v40 }
  0xc6   :  { %655 = vmatprep.mubr.f32.mxu0 %v1887_v3  ;;  %1304 = vmatpush3.msra.mxu0 %v2231_v21 }
  0xc7   :  { %1351 = vmatprep.subr.mxu1 %v1602_v9  ;;  %1305 = vmatprep.subr.mxu0 %v2232_v26  ;;  %v2246_v9 = vand.u32 4294901760, %v2212_v63 }
  0xc8   :  { %1352 = vmatpush3.msra.mxu1 %v1604_v10  ;;  %1306 = vmatpush3.msra.mxu0 %v2233_v27  ;;  %v2247_v10 = vand.u32 4294901760, %v2214_v0 }
  0xc9   :  { %1353 = vmatprep.subr.mxu1 %v1610_v12  ;;  %658 = vmatmul.mubr.f32.gmra.mxu0 %v1881_v49  ;;  %v2249_v12 = vld [vmem:[#allocation18_spill] sm:$0xff] }
  0xca   :  { %1307 = vmatprep.subr.mxu0 %v2234_v25  ;;  %1354 = vmatpush3.msra.mxu1 %v1612_v13  ;;  %v2250_v13 = vand.u32 4294901760, %v2216_v53 }
  0xcb   :  { %1308 = vmatpush3.msra.mxu0 %v2235_v28  ;;  %1141 = vmatprep.mubr.msk.f32.mxu0 %vm1845_vm13, %v2228_v15 }
  0xcc   :  { %1355 = vmatprep.subr.mxu1 %v1614_v16  ;;  %1309 = vmatprep.subr.mxu0 %v2236_v31  ;;  %v2251_v16 = vld [vmem:[#allocation20_spill] sm:$0xff] }
  0xcd   :  { %1356 = vmatpush3.msra.mxu1 %v1625_v14  ;;  %1310 = vmatpush3.msra.mxu0 %v2237_v32  ;;  %v2255_v14 = vld [vmem:[#allocation25_spill] sm:$0xff] }
  0xce   :  { %1357 = vmatprep.subr.mxu1 %v1678_v43  ;;  %1311 = vmatprep.subr.mxu0 %v2238_v33  ;;  %v2259_v43 = vand.u32 4294901760, %v2258_v30 }
  0xcf   :  { %1358 = vmatpush3.msra.mxu1 %v1681_v56  ;;  %1312 = vmatpush3.msra.mxu0 %v2239_v34  ;;  %v2261_v56 = vand.u32 4294901760, %v2223_v47 }
  0xd0   :  { %1359 = vmatprep.subr.mxu1 %v1683_v57  ;;  %1313 = vmatprep.subr.mxu0 %v2240_v36 }
  0xd1   :  { %1360 = vmatpush3.msra.mxu1 %v1685_v58  ;;  %1314 = vmatpush3.msra.mxu0 %v2241_v37 }
  0xd2   :  { %1361 = vmatprep.subr.mxu1 %v1690_v60  ;;  %1315 = vmatprep.subr.mxu0 %v2242_v38  ;;  %v2263_v60 = vand.u32 4294901760, %v2224_v1  ;;  %v2270_v1 = vand.u32 4294901760, %v1810_v35 }
  0xd3   :  { %1362 = vmatpush3.msra.mxu1 %v1692_v61  ;;  %1316 = vmatpush3.msra.mxu0 %v2243_v42  ;;  %v2264_v61 = vand.u32 4294901760, %v2225_v4 }
  0xd4   :  { %1363 = vmatprep.subr.mxu1 %v1694_v62  ;;  %1317 = vmatprep.subr.mxu0 %v2244_v5  ;;  %v2265_v62 = vand.u32 4294901760, %v2226_v39 }
  0xd5   :  { %1364 = vmatpush3.msra.mxu1 %v1706_v59  ;;  %1318 = vmatpush3.msra.mxu0 %v2245_v8 }
  0xd6   :  { %1365 = vmatprep.subr.mxu1 %v1759_v51  ;;  %1319 = vmatprep.subr.mxu0 %v2246_v9  ;;  %v2267_v51 = vand.u32 4294901760, %v1789_v52 }
  0xd7   :  { %1366 = vmatpush3.msra.mxu1 %v2213_v50  ;;  %1320 = vmatpush3.msra.mxu0 %v2247_v10 }
  0xd8   :  { %1367 = vmatprep.subr.mxu1 %v1763_v23  ;;  %1321 = vmatprep.subr.mxu0 %v2248_v11  ;;  %v2268_v23 = vand.u32 4294901760, %v1792_v48 }
  0xd9   :  { %1368 = vmatpush3.msra.mxu1 %v2249_v12  ;;  %1322 = vmatpush3.msra.mxu0 %v2250_v13 }
  0xda   :  { %1369 = vmatprep.subr.mxu1 %v2251_v16  ;;  %1323 = vmatprep.subr.mxu0 %v2252_v17 }
  0xdb   :  { %1370 = vmatpush3.msra.mxu1 %v2253_v18  ;;  %1324 = vmatpush3.msra.mxu0 %v2254_v22 }
  0xdc   :  { %1371 = vmatprep.subr.mxu1 %v2255_v14  ;;  %1325 = vmatprep.subr.mxu0 %v2256_v24 }
  0xdd   :  { %1372 = vmatpush3.msra.mxu1 %v2257_v29  ;;  %1326 = vmatpush3.msra.mxu0 %v2259_v43 }
  0xde   :  { %1146 = vmatmul.mubr.msk.f32.vlgmr.msra.gmra.mxu1 %vm1841_vm12, %v2228_v15  ;;  %1327 = vmatprep.subr.mxu0 %v2261_v56 }
  0xdf   :  { %1147 = vmatprep.mubr.msk.f32.mxu1 %vm1873_vm11, %v2228_v15  ;;  %1328 = vmatpush3.msra.mxu0 %v2263_v60 }
  0xe0   :  { %1329 = vmatprep.subr.mxu0 %v2264_v61 }
  0xe1   :  { %1330 = vmatpush3.msra.mxu0 %v2265_v62 }
  0xe2   :  { %1148 = vmatmul.mubr.msk.f32.gmra.mxu1 %vm1865_vm10, %v2228_v15  ;;  %1331 = vmatprep.subr.mxu0 %v2267_v51 }
  0xe3   :  { %1332 = vmatpush3.msra.mxu0 %v2268_v23 }
  0xe4   :  { %1333 = vmatprep.subr.mxu0 %v2269_v7 }
  0xe5   :  { %1334 = vmatpush3.msra.mxu0 %v2270_v1 }
  0xe6   :  { %1142 = vmatmul.mubr.msk.f32.vlgmr.msra.gmra.mxu0 %vm1841_vm12, %v2228_v15 }
  0xe7   :  { %1143 = vmatprep.mubr.msk.f32.mxu0 %vm1873_vm11, %v2228_v15 }
  0xea   :  { %1144 = vmatmul.mubr.msk.f32.gmra.mxu0 %vm1865_vm10, %v2228_v15 }
 0x158   :  { %v1221_v4 = vpop.f32.mrf.mxu1 }
 0x15a   :  { %v1222_v52 = vpop.f32.mrf.mxu1 }
 0x15b   :  { %v1223_v0 = vadd.f32 %v1222_v52, %v1221_v4 }
 0x15e   :  { %v1224_v39 = vpop.f32.mrf.mxu1 }
 0x160   :  { %v1225_v54 = vpop.f32.mrf.mxu1 }
 0x161   :  { %v1183_v48 = vpop.f32.mrf.mxu0  ;;  %v1226_v20 = vadd.f32 %v1225_v54, %v1224_v39 }
 0x163   :  { %v1184_v41 = vpop.f32.mrf.mxu0 }
 0x164   :  { %v1185_v63 = vadd.f32 %v1184_v41, %v1183_v48  ;;  %v1149_v48 = vld [vmem:[%s2099_s5] ss:$0 sm:$0xff] }
 0x165   :  { %v1150_v41 = vld [vmem:[%s2100_s6] ss:$0 sm:$0xff] }
 0x166   :  { %v506_v47 = vadd.f32 %v1223_v0, %v1185_v63 }
 0x16a   :  { %v1186_v35 = vpop.f32.mrf.mxu0 }
 0x16c   :  { %v1187_v3 = vpop.f32.mrf.mxu0 }
 0x16d   :  { %v1188_v15 = vadd.f32 %v1187_v3, %v1186_v35 }
 0x16f   :  { %v513_v25 = vadd.f32 %v1226_v20, %v1188_v15 }
 0x17a   :  { %v1297_v45 = vpop.f32.mrf.mxu1 }
 0x17c   :  { %v1298_v55 = vpop.f32.mrf.mxu1 }
 0x17d   :  { %v1299_v28 = vadd.f32 %v1298_v55, %v1297_v45 }
 0x17f   :  { %v1300_v49 = vpop.f32.mrf.mxu1 }
 0x181   :  { %v1301_v6 = vpop.f32.mrf.mxu1 }
 0x182   :  { %v1302_v38 = vadd.f32 %v1301_v6, %v1300_v49 }
 0x184   :  { %v1259_v46 = vpop.f32.mrf.mxu0 }
 0x186   :  { %v1260_v44 = vpop.f32.mrf.mxu0 }
 0x187   :  { %v1261_v2 = vadd.f32 %v1260_v44, %v1259_v46 }
 0x189   :  { %v1262_v40 = vpop.f32.mrf.mxu0  ;;  %v651_v21 = vadd.f32 %v1261_v2, %v506_v47 }
 0x18b   :  { %v1263_v53 = vpop.f32.mrf.mxu0  ;;  %v768_v34 = vadd.f32 %v1299_v28, %v651_v21 }
 0x18c   :  { %v1264_v26 = vadd.f32 %v1263_v53, %v1262_v40 }
 0x18e   :  { %v660_v33 = vadd.f32 %v1264_v26, %v513_v25 }
 0x190   :  { %v779_v10 = vadd.f32 %v1302_v38, %v660_v33 }
 0x19e   :  { %v1373_v50 = vpop.f32.mrf.mxu1 }
 0x1a0   :  { %v1374_v19 = vpop.f32.mrf.mxu1 }
 0x1a1   :  { %v1375_v42 = vadd.f32 %v1374_v19, %v1373_v50 }
 0x1a2   :  { %v1376_v31 = vpop.f32.mrf.mxu1 }
 0x1a4   :  { %v1377_v8 = vpop.f32.mrf.mxu1 }
 0x1a5   :  { %v1378_v13 = vadd.f32 %v1377_v8, %v1376_v31 }
 0x1a6   :  { %v1335_v27 = vpop.f32.mrf.mxu0 }
 0x1a8   :  { %v1336_v32 = vpop.f32.mrf.mxu0 }
 0x1a9   :  { %v1337_v36 = vadd.f32 %v1336_v32, %v1335_v27 }
 0x1aa   :  { %v1338_v37 = vpop.f32.mrf.mxu0 }
 0x1ab   :  { %v947_v5 = vadd.f32 %v1337_v36, %v768_v34 }
 0x1ac   :  { %v1339_v9 = vpop.f32.mrf.mxu0 }
 0x1ad   :  { %v1340_v11 = vadd.f32 %v1339_v9, %v1338_v37  ;;  %v1058_v12 = vadd.f32 %v1375_v42, %v947_v5 }
 0x1af   :  { %v954_v16 = vadd.f32 %v1340_v11, %v779_v10  ;;  %1068 = vadd.xlane.f32.xlu0 %v1058_v12  ;;  %v1072_v17 = vmul.f32 %v1058_v12, %v1058_v12 }
 0x1b1   :  { %v1065_v18 = vadd.f32 %v1378_v13, %v954_v16 }
 0x1b3   :  { %1074 = vadd.xlane.f32.xlu0 %v1072_v17  ;;  %1070 = vadd.xlane.f32.xlu1 %v1065_v18  ;;  %v1073_v22 = vmul.f32 %v1065_v18, %v1065_v18 }
 0x1b7   :  { %1076 = vadd.xlane.f32.xlu0 %v1073_v22 }
 0x238   :  { %v1069_v14 = vpop.xlane.xlu0 %1068 }
 0x239   :  { %v1078_v24 = vmul.f32 0.03125, %v1069_v14 }
 0x23b   :  { %v1082_v43 = vmul.f32 %v1078_v24, %v1078_v24  ;;  %v1088_v4 = vsub.f32 %v1058_v12, %v1078_v24 }
 0x23c   :  { %v1075_v29 = vpop.xlane.xlu0 %1074  ;;  %v1071_v30 = vpop.xlane.xlu1 %1070 }
 0x23d   :  { %v1080_v58 = vmul.f32 0.03125, %v1075_v29  ;;  %v1079_v56 = vmul.f32 0.03125, %v1071_v30 }
 0x23f   :  { %v1084_v57 = vsub.f32 %v1080_v58, %v1082_v43  ;;  %v1083_v62 = vmul.f32 %v1079_v56, %v1079_v56  ;;  %v1089_v54 = vsub.f32 %v1065_v18, %v1079_v56 }
 0x240   :  { %v1077_v60 = vpop.xlane.xlu0 %1076 }
 0x241   :  { %v1086_v61 = vmax.f32 %v1084_v57, 0.0  ;;  %v1081_v59 = vmul.f32 0.03125, %v1077_v60 }
 0x243   :  { %v1090_v51 = vadd.f32 1e-12, %v1086_v61  ;;  %v1085_v23 = vsub.f32 %v1081_v59, %v1083_v62 }
 0x245   :  { %1388 = vrsqrt.f32 %v1090_v51  ;;  %v1087_v7 = vmax.f32 %v1085_v23, 0.0 }
 0x247   :  { %v1091_v1 = vadd.f32 1e-12, %v1087_v7 }
 0x249   :  { %1390 = vrsqrt.f32 %v1091_v1 }
 0x252   :  { %v1389_v52 = vpop.eup %1388 }
 0x253   :  { %v1094_v39 = vmul.f32 %v1389_v52, %v1088_v4 }
 0x255   :  { %v1103_v35 = vmul.f32 %v1149_v48, %v1094_v39 }
 0x256   :  { %v1391_v45 = vpop.eup %1390 }
 0x257   :  { %v1095_v3 = vmul.f32 %v1391_v45, %v1089_v54  ;;  %v1112_v55 = vadd.f32 %v1150_v41, %v1103_v35 }
 0x259   :  { %v1104_v46 = vmul.f32 %v1149_v48, %v1095_v3  ;;  %1114 = vst [vmem:[#allocation5] sm:$0xff] %v1112_v55 }
 0x25b   :  { %v1113_v49 = vadd.f32 %v1150_v41, %v1104_v46 }
 0x25d   :  { %1115 = vst [vmem:[#allocation5 + $0x8] sm:$0xff] %v1113_v49 }
 0x25e   :  { %1423 = shalt.err (!%p1420_p9)
}
 0x25f   :  { %1127 = dma.vmem_to_hbm [thread:$0]  %s1122_s24, 256, %s2101_s7, [#allocation4], %s1437_s27, %s1437_s27, %s1438_s28  }
 0x260   :  { %1434 = dma.done.wait [#allocation4], 256  }
 0x261   :  { %1435 = vsyncadd [#allocation4], 4294967040 }
 0x262   :  { %1131 = vsyncpa [#allocation3], 1 }
 0x263   :  { %1132 = vsyncpa [#allocation4], 1 }

</bundles_post_ra>
